<compile_context>
chip_gen: v5e
topology: v5e:2x2
jax: 0.10.0
libtpu: 0.0.40
codegen_flags: <defaults>
</compile_context>

<pallas_src>
import functools

import jax
import jax.numpy as jnp
from jax import lax
from jax.experimental import pallas as pl
from jax.experimental.pallas import tpu as pltpu

_LANE = 512            # lane-dense last dim (multiple of 128)
_MAX_BLOCK_ROWS = 512  # 512 x 512 f32 block = 1 MiB per pipeline buffer


def _rand_slab_kernel(seed_ref, out_ref, *, block_rows, lane):
    """Fill out_ref (block_rows, lane) with uniform [0, 1) float32 values.

    Stateless counter-based PRNG: hash(global_element_index, seed) via the
    murmur3 32-bit finalizer.  Purely VPU integer ops — the store slot / HBM
    writeback remains the binding resource for this write-only kernel.
    """
    tile = pl.program_id(0)
    row = lax.broadcasted_iota(jnp.int32, (block_rows, lane), 0)
    col = lax.broadcasted_iota(jnp.int32, (block_rows, lane), 1)
    idx = (tile * block_rows + row) * lane + col          # global linear index
    x = lax.bitcast_convert_type(idx, jnp.uint32)

    # Mix in the seed, then murmur3 fmix32.
    x = x ^ (seed_ref[0] * jnp.uint32(0x9E3779B9))
    x = x ^ (x >> 16)
    x = x * jnp.uint32(0x85EBCA6B)
    x = x ^ (x >> 13)
    x = x * jnp.uint32(0xC2B2AE35)
    x = x ^ (x >> 16)

    # Top 24 bits -> uniform float32 in [0, 1) (exact in f32).
    mant = lax.bitcast_convert_type(x >> 8, jnp.int32)    # < 2**24, nonnegative
    out_ref[...] = mant.astype(jnp.float32) * jnp.float32(1.0 / (1 << 24))


def position_embedding_random(shape, num_pos_feats: int = 64, seed: int = 0):
    """Equivalent of PositionEmbeddingRandom(num_pos_feats).forward(shape).

    shape: (height, width)
    returns: float32 array [2*num_pos_feats, H, W] of uniform [0, 1) values.
    """
    h, w = shape
    c = 2 * num_pos_feats
    total = c * h * w

    # Flat lane-dense slab, row count rounded up to the f32 sublane multiple.
    rows = pl.cdiv(total, _LANE)
    rows = ((rows + 7) // 8) * 8
    block_rows = min(_MAX_BLOCK_ROWS, rows)
    grid = pl.cdiv(rows, block_rows)
    rows_padded = grid * block_rows

    seed_arr = jnp.asarray([seed], dtype=jnp.uint32)

    slab = pl.pallas_call(
        functools.partial(_rand_slab_kernel, block_rows=block_rows, lane=_LANE),
        out_shape=jax.ShapeDtypeStruct((rows_padded, _LANE), jnp.float32),
        grid=(grid,),
        in_specs=[pl.BlockSpec(memory_space=pltpu.MemorySpace.SMEM)],
        out_specs=pl.BlockSpec((block_rows, _LANE), lambda i: (i, 0)),
        compiler_params=pltpu.CompilerParams(
            dimension_semantics=("parallel",)),
    )(seed_arr)

    # Contiguous reshape (+ tiny trailing-pad slice) back to [C, H, W].
    flat = slab.reshape(-1)
    if flat.shape[0] != total:
        flat = flat[:total]
    return flat.reshape(c, h, w)


if __name__ == "__main__":
    key = jax.random.PRNGKey(0)
    # Small dummy NCHW feature map just to supply the (H, W) the module sees.
    x = jax.random.normal(key, (2, 4, 16, 16), dtype=jnp.float32)
    h, w = x.shape[-2], x.shape[-1]

    # Note: at this tiny size the call is launch-overhead dominated; the tiling
    # above only pays off at SAM-scale feature maps (e.g. C=128, H=W=256).
    pe = position_embedding_random((h, w), num_pos_feats=64, seed=0)
    pe = jax.block_until_ready(pe)

    assert pe.shape == (128, h, w), pe.shape
    assert pe.dtype == jnp.float32
    assert bool(jnp.all(pe >= 0.0)) and bool(jnp.all(pe < 1.0))
    mean = float(jnp.mean(pe))
    assert 0.4 < mean < 0.6, mean  # crude uniformity sanity check

    # TODO(synk): torch.rand's exact Philox/MT bit stream is not reproducible;
    # this stub only needs *a* uniform [0,1) tensor, which the counter hash
    # provides deterministically per seed.
    print("KERNEL_OK")
</pallas_src>

<mosaic_0001>
module attributes {stable_mosaic.version = 11 : i64} {
  func.func @_rand_slab_kernel(%arg0: i32, %arg1: memref<1xi32, #tpu.memory_space<smem>>, %arg2: memref<64x512xf32, #tpu.memory_space<vmem>>) attributes {dimension_semantics = [#tpu.dimension_semantics<parallel>], iteration_bounds = array<i64: 1>, scalar_prefetch = 0 : i64, scratch_operands = 0 : i64, tpu.core_type = #tpu.core_type<tc>, window_params = [{transform_indices = @transform_0, window_bounds = array<i64: 1>}, {transform_indices = @transform_1, window_bounds = array<i64: 64, 512>}]} {
    %0 = tpu.iota {dimensions = array<i32: 0>} : vector<64x512xi32>
    %1 = tpu.iota {dimensions = array<i32: 1>} : vector<64x512xi32>
    %c64_i32 = arith.constant 64 : i32
    %2 = arith.muli %arg0, %c64_i32 : i32
    %3 = vector.broadcast %2 : i32 to vector<64x512xi32>
    %4 = arith.addi %3, %0 : vector<64x512xi32>
    %c512_i32 = arith.constant 512 : i32
    %5 = vector.broadcast %c512_i32 : i32 to vector<64x512xi32>
    %6 = arith.muli %4, %5 : vector<64x512xi32>
    %7 = arith.addi %6, %1 : vector<64x512xi32>
    %8 = tpu.bitcast %7 : vector<64x512xi32> -> vector<64x512xi32>
    %c0 = arith.constant 0 : index
    %9 = memref.load %arg1[%c0] : memref<1xi32, #tpu.memory_space<smem>>
    %c-1640531527_i32 = arith.constant -1640531527 : i32
    %10 = arith.muli %9, %c-1640531527_i32 : i32
    %11 = vector.broadcast %10 : i32 to vector<64x512xi32>
    %12 = arith.xori %8, %11 : vector<64x512xi32>
    %c16_i32 = arith.constant 16 : i32
    %13 = vector.broadcast %c16_i32 : i32 to vector<64x512xi32>
    %14 = arith.shrui %12, %13 : vector<64x512xi32>
    %15 = arith.xori %12, %14 : vector<64x512xi32>
    %c-2048144789_i32 = arith.constant -2048144789 : i32
    %16 = vector.broadcast %c-2048144789_i32 : i32 to vector<64x512xi32>
    %17 = arith.muli %15, %16 : vector<64x512xi32>
    %c13_i32 = arith.constant 13 : i32
    %18 = vector.broadcast %c13_i32 : i32 to vector<64x512xi32>
    %19 = arith.shrui %17, %18 : vector<64x512xi32>
    %20 = arith.xori %17, %19 : vector<64x512xi32>
    %c-1028477387_i32 = arith.constant -1028477387 : i32
    %21 = vector.broadcast %c-1028477387_i32 : i32 to vector<64x512xi32>
    %22 = arith.muli %20, %21 : vector<64x512xi32>
    %c16_i32_0 = arith.constant 16 : i32
    %23 = vector.broadcast %c16_i32_0 : i32 to vector<64x512xi32>
    %24 = arith.shrui %22, %23 : vector<64x512xi32>
    %25 = arith.xori %22, %24 : vector<64x512xi32>
    %c8_i32 = arith.constant 8 : i32
    %26 = vector.broadcast %c8_i32 : i32 to vector<64x512xi32>
    %27 = arith.shrui %25, %26 : vector<64x512xi32>
    %28 = tpu.bitcast %27 : vector<64x512xi32> -> vector<64x512xi32>
    %29 = arith.sitofp %28 : vector<64x512xi32> to vector<64x512xf32>
    %cst = arith.constant 5.96046448E-8 : f32
    %30 = vector.broadcast %cst : f32 to vector<64x512xf32>
    %31 = arith.mulf %29, %30 : vector<64x512xf32>
    %c0_1 = arith.constant 0 : index
    %c0_2 = arith.constant 0 : index
    %32 = vector.load %arg2[%c0_1, %c0_2] : memref<64x512xf32, #tpu.memory_space<vmem>>, vector<64x512xf32>
    tpu.vector_store %arg2[%c0_1, %c0_2], %31 {strides = array<i32>} : memref<64x512xf32, #tpu.memory_space<vmem>>, vector<64x512xf32>,
    return
  }
  func.func @transform_0(%arg0: i32) -> i32 {
    %c0_i32 = arith.constant 0 : i32
    %c0_i32_0 = arith.constant 0 : i32
    return %c0_i32 : i32
  }
  func.func @transform_1(%arg0: i32) -> (i32, i32) {
    %c0_i32 = arith.constant 0 : i32
    %c0_i32_0 = arith.constant 0 : i32
    return %arg0, %c0_i32 : i32, i32
  }
}

</mosaic_0001>

<bundles_post_ra>
// kernel: tpu_custom_call.1
= control target key start
LH: loop header
LB: loop body
LE: loop exit
PB: predicated region body
PF: predicated region fallthrough
CT: control target
= control target key end

     0   :  { %v10_v0 = vlaneseq  ;;  %s677_s0 = inlined_call_operand.<no memory space> [shape: u32[1], index: 0, kind: input, shape index: {}]   ;;  %s678_s1 = inlined_call_operand.hbm [shape: f32[64,512], index: 1, kind: output, shape index: {}]  }
   0x1   :  { %s75_s8 = smul.u32 2654435769, %s677_s0 }
   0x2   :  { %7 = vsyncpa [#allocation4], 0  ;;  %v556_v1 = vshrl.u32 %v10_v0, 7  ;;  %v558_v2 = vand.u32 127, %v10_v0  ;;  %s540_s0 = smov [#allocation3]   ;;  %s499_s12 = sshll.u32 %s678_s1, 4  ;;  %s500_s12 = int_to_ptr.hbm [resolvable:$true] %s499_s12 }
   0x3   :  { %v560_v3 = vstv %s75_s8  ;;  %s497_s9 = sshll.u32 %s540_s0, 4  ;;  %s541_s13 = smov 512   ;;  %s498_s9 = int_to_ptr.vmem [resolvable:$true] %s497_s9 }
   0x4   :  { %v34_v4 = vmul.u32 512, %v556_v1  ;;  %v564_v5 = vadd.s32 128, %v558_v2  ;;  %v567_v6 = vadd.s32 256, %v558_v2  ;;  %v570_v7 = vadd.s32 384, %v558_v2  ;;  %s542_s14 = smov 32  }
   0x5   :  { %v12_v8 = vadd.s32 8, %v556_v1  ;;  %v13_v9 = vadd.s32 16, %v556_v1  ;;  %v14_v10 = vadd.s32 24, %v556_v1  ;;  %v15_v11 = vadd.s32 32, %v556_v1 }
   0x6   :  { %v42_v12 = vadd.s32 %v34_v4, %v558_v2  ;;  %v43_v13 = vadd.s32 %v34_v4, %v564_v5  ;;  %v44_v14 = vadd.s32 %v34_v4, %v567_v6  ;;  %v45_v15 = vadd.s32 %v34_v4, %v570_v7 }
   0x7   :  { %v35_v16 = vmul.u32 512, %v12_v8  ;;  %v580_v17 = vmul.u32 512, %v13_v9  ;;  %v582_v18 = vmul.u32 512, %v14_v10  ;;  %v584_v19 = vmul.u32 512, %v15_v11 }
   0x8   :  { %v77_v20 = vxor.u32 %v560_v3, %v42_v12  ;;  %v78_v21 = vxor.u32 %v560_v3, %v43_v13  ;;  %v79_v22 = vxor.u32 %v560_v3, %v44_v14  ;;  %v80_v23 = vxor.u32 %v560_v3, %v45_v15 }
   0x9   :  { %v46_v24 = vadd.s32 %v35_v16, %v558_v2  ;;  %v47_v25 = vadd.s32 %v35_v16, %v564_v5  ;;  %v48_v26 = vadd.s32 %v35_v16, %v567_v6  ;;  %v49_v27 = vadd.s32 %v35_v16, %v570_v7 }
   0xa   :  { %v109_v28 = vshrl.u32 %v77_v20, 16  ;;  %v110_v29 = vshrl.u32 %v78_v21, 16  ;;  %v111_v30 = vshrl.u32 %v79_v22, 16  ;;  %v112_v31 = vshrl.u32 %v80_v23, 16 }
   0xb   :  { %v81_v32 = vxor.u32 %v560_v3, %v46_v24  ;;  %v82_v33 = vxor.u32 %v560_v3, %v47_v25  ;;  %v83_v34 = vxor.u32 %v560_v3, %v48_v26  ;;  %v84_v35 = vxor.u32 %v560_v3, %v49_v27 }
   0xc   :  { %v141_v36 = vxor.u32 %v109_v28, %v77_v20  ;;  %v142_v37 = vxor.u32 %v110_v29, %v78_v21  ;;  %v143_v38 = vxor.u32 %v111_v30, %v79_v22  ;;  %v144_v39 = vxor.u32 %v112_v31, %v80_v23 }
   0xd   :  { %v113_v40 = vshrl.u32 %v81_v32, 16  ;;  %v114_v41 = vshrl.u32 %v82_v33, 16  ;;  %v115_v42 = vshrl.u32 %v83_v34, 16  ;;  %v116_v43 = vshrl.u32 %v84_v35, 16 }
   0xe   :  { %v173_v44 = vmul.u32 2246822507, %v141_v36  ;;  %v174_v45 = vmul.u32 2246822507, %v142_v37  ;;  %v175_v46 = vmul.u32 2246822507, %v143_v38  ;;  %v50_v47 = vadd.s32 %v580_v17, %v558_v2 }
   0xf   :  { %v176_v48 = vmul.u32 2246822507, %v144_v39  ;;  %v145_v49 = vxor.u32 %v113_v40, %v81_v32  ;;  %v146_v50 = vxor.u32 %v114_v41, %v82_v33  ;;  %v147_v51 = vxor.u32 %v115_v42, %v83_v34 }
  0x10   :  { %v205_v52 = vshrl.u32 %v173_v44, 13  ;;  %v206_v53 = vshrl.u32 %v174_v45, 13  ;;  %v207_v54 = vshrl.u32 %v175_v46, 13  ;;  %v148_v55 = vxor.u32 %v116_v43, %v84_v35 }
  0x11   :  { %v208_v56 = vshrl.u32 %v176_v48, 13  ;;  %v177_v57 = vmul.u32 2246822507, %v145_v49  ;;  %v178_v58 = vmul.u32 2246822507, %v146_v50  ;;  %v601_v59 = vxor.u32 %v560_v3, %v50_v47 }
  0x12   :  { %v237_v60 = vxor.u32 %v205_v52, %v173_v44  ;;  %v238_v61 = vxor.u32 %v206_v53, %v174_v45  ;;  %v239_v62 = vxor.u32 %v207_v54, %v175_v46  ;;  %v179_v63 = vmul.u32 2246822507, %v147_v51 }
  0x13   :  { %v240_v0 = vxor.u32 %v208_v56, %v176_v48  ;;  %v209_v4 = vshrl.u32 %v177_v57, 13  ;;  %v210_v8 = vshrl.u32 %v178_v58, 13  ;;  %v180_v9 = vmul.u32 2246822507, %v148_v55 }
  0x14   :  { %v269_v10 = vmul.u32 3266489909, %v237_v60  ;;  %v270_v11 = vmul.u32 3266489909, %v238_v61  ;;  %v271_v12 = vmul.u32 3266489909, %v239_v62  ;;  %v51_v13 = vadd.s32 %v580_v17, %v564_v5 }
  0x15   :  { %v272_v14 = vmul.u32 3266489909, %v240_v0  ;;  %v241_v15 = vxor.u32 %v209_v4, %v177_v57  ;;  %v242_v16 = vxor.u32 %v210_v8, %v178_v58  ;;  %v211_v20 = vshrl.u32 %v179_v63, 13 }
  0x16   :  { %v301_v21 = vshrl.u32 %v269_v10, 16  ;;  %v302_v22 = vshrl.u32 %v270_v11, 16  ;;  %v303_v23 = vshrl.u32 %v271_v12, 16  ;;  %v212_v24 = vshrl.u32 %v180_v9, 13 }
  0x17   :  { %v304_v25 = vshrl.u32 %v272_v14, 16  ;;  %v273_v26 = vmul.u32 3266489909, %v241_v15  ;;  %v274_v27 = vmul.u32 3266489909, %v242_v16  ;;  %v243_v28 = vxor.u32 %v211_v20, %v179_v63 }
  0x18   :  { %v333_v29 = vxor.u32 %v301_v21, %v269_v10  ;;  %v334_v30 = vxor.u32 %v302_v22, %v270_v11  ;;  %v335_v31 = vxor.u32 %v303_v23, %v271_v12  ;;  %v244_v32 = vxor.u32 %v212_v24, %v180_v9 }
  0x19   :  { %v336_v33 = vxor.u32 %v304_v25, %v272_v14  ;;  %v305_v34 = vshrl.u32 %v273_v26, 16  ;;  %v306_v35 = vshrl.u32 %v274_v27, 16  ;;  %v275_v36 = vmul.u32 3266489909, %v243_v28 }
  0x1a   :  { %v365_v37 = vshrl.u32 %v333_v29, 8  ;;  %v366_v38 = vshrl.u32 %v334_v30, 8  ;;  %v367_v39 = vshrl.u32 %v335_v31, 8  ;;  %v276_v40 = vmul.u32 3266489909, %v244_v32 }
  0x1b   :  { %v368_v41 = vshrl.u32 %v336_v33, 8  ;;  %v337_v42 = vxor.u32 %v305_v34, %v273_v26  ;;  %v338_v43 = vxor.u32 %v306_v35, %v274_v27  ;;  %v307_v44 = vshrl.u32 %v275_v36, 16 }
  0x1c   :  { %v397_v45 = vcvt.s32.f32 %v365_v37  ;;  %v398_v46 = vcvt.s32.f32 %v366_v38  ;;  %v399_v47 = vcvt.s32.f32 %v367_v39  ;;  %v308_v48 = vshrl.u32 %v276_v40, 16 }
  0x1d   :  { %v400_v49 = vcvt.s32.f32 %v368_v41  ;;  %v369_v50 = vshrl.u32 %v337_v42, 8  ;;  %v370_v51 = vshrl.u32 %v338_v43, 8  ;;  %v339_v52 = vxor.u32 %v307_v44, %v275_v36 }
  0x1e   :  { %v429_v53 = vmul.f32 5.9604645e-08, %v397_v45  ;;  %v430_v54 = vmul.f32 5.9604645e-08, %v398_v46  ;;  %v431_v55 = vmul.f32 5.9604645e-08, %v399_v47  ;;  %v340_v56 = vxor.u32 %v308_v48, %v276_v40 }
  0x1f   :  { %v432_v57 = vmul.f32 5.9604645e-08, %v400_v49  ;;  %v401_v58 = vcvt.s32.f32 %v369_v50  ;;  %v402_v60 = vcvt.s32.f32 %v370_v51  ;;  %v371_v61 = vshrl.u32 %v339_v52, 8 }
  0x20   :  { %461 = vst [vmem:[#allocation3] sm:$0xff] %v429_v53  ;;  %v372_v62 = vshrl.u32 %v340_v56, 8  ;;  %v117_v63 = vshrl.u32 %v601_v59, 16  ;;  %v86_v0 = vxor.u32 %v560_v3, %v51_v13  ;;  %v52_v4 = vadd.s32 %v580_v17, %v567_v6 }
  0x21   :  { %462 = vst [vmem:[#allocation3 + $0x8] sm:$0xff] %v430_v54  ;;  %v433_v8 = vmul.f32 5.9604645e-08, %v401_v58  ;;  %v434_v9 = vmul.f32 5.9604645e-08, %v402_v60  ;;  %v403_v10 = vcvt.s32.f32 %v371_v61  ;;  %v53_v11 = vadd.s32 %v580_v17, %v570_v7 }
  0x22   :  { %463 = vst [vmem:[#allocation3 + $0x10] sm:$0xff] %v431_v55  ;;  %v404_v12 = vcvt.s32.f32 %v372_v62  ;;  %v149_v14 = vxor.u32 %v117_v63, %v601_v59  ;;  %v118_v15 = vshrl.u32 %v86_v0, 16  ;;  %v87_v16 = vxor.u32 %v560_v3, %v52_v4 }
  0x23   :  { %464 = vst [vmem:[#allocation3 + $0x18] sm:$0xff] %v432_v57  ;;  %v435_v20 = vmul.f32 5.9604645e-08, %v403_v10  ;;  %v88_v13 = vxor.u32 %v560_v3, %v53_v11  ;;  %v54_v21 = vadd.s32 %v582_v18, %v558_v2  ;;  %v55_v22 = vadd.s32 %v582_v18, %v564_v5 }
  0x24   :  { %465 = vst [vmem:[#allocation3 + $0x20] sm:$0xff] %v433_v8  ;;  %v436_v23 = vmul.f32 5.9604645e-08, %v404_v12  ;;  %v181_v17 = vmul.u32 2246822507, %v149_v14  ;;  %v150_v24 = vxor.u32 %v118_v15, %v86_v0  ;;  %v119_v25 = vshrl.u32 %v87_v16, 16 }
  0x25   :  { %466 = vst [vmem:[#allocation3 + $0x28] sm:$0xff] %v434_v9  ;;  %v120_v59 = vshrl.u32 %v88_v13, 16  ;;  %v89_v26 = vxor.u32 %v560_v3, %v54_v21  ;;  %v90_v27 = vxor.u32 %v560_v3, %v55_v22  ;;  %v56_v28 = vadd.s32 %v582_v18, %v567_v6 }
  0x26   :  { %467 = vst [vmem:[#allocation3 + $0x30] sm:$0xff] %v435_v20  ;;  %v213_v29 = vshrl.u32 %v181_v17, 13  ;;  %v182_v30 = vmul.u32 2246822507, %v150_v24  ;;  %v151_v31 = vxor.u32 %v119_v25, %v87_v16  ;;  %v57_v32 = vadd.s32 %v582_v18, %v570_v7 }
  0x27   :  { %468 = vst [vmem:[#allocation3 + $0x38] sm:$0xff] %v436_v23  ;;  %v152_v33 = vxor.u32 %v120_v59, %v88_v13  ;;  %v121_v34 = vshrl.u32 %v89_v26, 16  ;;  %v122_v35 = vshrl.u32 %v90_v27, 16  ;;  %v91_v36 = vxor.u32 %v560_v3, %v56_v28 }
  0x28   :  { %v245_v37 = vxor.u32 %v213_v29, %v181_v17  ;;  %v214_v38 = vshrl.u32 %v182_v30, 13  ;;  %v183_v39 = vmul.u32 2246822507, %v151_v31  ;;  %v92_v40 = vxor.u32 %v560_v3, %v57_v32 }
  0x29   :  { %v184_v41 = vmul.u32 2246822507, %v152_v33  ;;  %v153_v42 = vxor.u32 %v121_v34, %v89_v26  ;;  %v154_v43 = vxor.u32 %v122_v35, %v90_v27  ;;  %v123_v44 = vshrl.u32 %v91_v36, 16 }
  0x2a   :  { %v277_v45 = vmul.u32 3266489909, %v245_v37  ;;  %v246_v46 = vxor.u32 %v214_v38, %v182_v30  ;;  %v215_v47 = vshrl.u32 %v183_v39, 13  ;;  %v124_v48 = vshrl.u32 %v92_v40, 16 }
  0x2b   :  { %v216_v18 = vshrl.u32 %v184_v41, 13  ;;  %v185_v49 = vmul.u32 2246822507, %v153_v42  ;;  %v186_v50 = vmul.u32 2246822507, %v154_v43  ;;  %v155_v51 = vxor.u32 %v123_v44, %v91_v36 }
  0x2c   :  { %v309_v52 = vshrl.u32 %v277_v45, 16  ;;  %v278_v53 = vmul.u32 3266489909, %v246_v46  ;;  %v247_v54 = vxor.u32 %v215_v47, %v183_v39  ;;  %v156_v55 = vxor.u32 %v124_v48, %v92_v40 }
  0x2d   :  { %v248_v56 = vxor.u32 %v216_v18, %v184_v41  ;;  %v217_v57 = vshrl.u32 %v185_v49, 13  ;;  %v218_v58 = vshrl.u32 %v186_v50, 13  ;;  %v187_v60 = vmul.u32 2246822507, %v155_v51 }
  0x2e   :  { %v341_v61 = vxor.u32 %v309_v52, %v277_v45  ;;  %v310_v62 = vshrl.u32 %v278_v53, 16  ;;  %v279_v63 = vmul.u32 3266489909, %v247_v54  ;;  %v188_v0 = vmul.u32 2246822507, %v156_v55 }
  0x2f   :  { %v280_v4 = vmul.u32 3266489909, %v248_v56  ;;  %v249_v8 = vxor.u32 %v217_v57, %v185_v49  ;;  %v250_v9 = vxor.u32 %v218_v58, %v186_v50  ;;  %v219_v10 = vshrl.u32 %v187_v60, 13 }
  0x30   :  { %v373_v11 = vshrl.u32 %v341_v61, 8  ;;  %v342_v12 = vxor.u32 %v310_v62, %v278_v53  ;;  %v311_v14 = vshrl.u32 %v279_v63, 16  ;;  %v220_v15 = vshrl.u32 %v188_v0, 13 }
  0x31   :  { %v312_v16 = vshrl.u32 %v280_v4, 16  ;;  %v281_v20 = vmul.u32 3266489909, %v249_v8  ;;  %v282_v13 = vmul.u32 3266489909, %v250_v9  ;;  %v251_v21 = vxor.u32 %v219_v10, %v187_v60 }
  0x32   :  { %v405_v22 = vcvt.s32.f32 %v373_v11  ;;  %v374_v23 = vshrl.u32 %v342_v12, 8  ;;  %v343_v17 = vxor.u32 %v311_v14, %v279_v63  ;;  %v252_v24 = vxor.u32 %v220_v15, %v188_v0 }
  0x33   :  { %v344_v25 = vxor.u32 %v312_v16, %v280_v4  ;;  %v313_v59 = vshrl.u32 %v281_v20, 16  ;;  %v314_v26 = vshrl.u32 %v282_v13, 16  ;;  %v283_v27 = vmul.u32 3266489909, %v251_v21 }
  0x34   :  { %v437_v28 = vmul.f32 5.9604645e-08, %v405_v22  ;;  %v406_v29 = vcvt.s32.f32 %v374_v23  ;;  %v375_v30 = vshrl.u32 %v343_v17, 8  ;;  %v284_v31 = vmul.u32 3266489909, %v252_v24 }
  0x35   :  { %v376_v32 = vshrl.u32 %v344_v25, 8  ;;  %v345_v33 = vxor.u32 %v313_v59, %v281_v20  ;;  %v346_v34 = vxor.u32 %v314_v26, %v282_v13  ;;  %v315_v35 = vshrl.u32 %v283_v27, 16 }
  0x36   :  { %469 = vst [vmem:[#allocation3 + $0x40] sm:$0xff] %v437_v28  ;;  %v438_v36 = vmul.f32 5.9604645e-08, %v406_v29  ;;  %v407_v37 = vcvt.s32.f32 %v375_v30  ;;  %v316_v38 = vshrl.u32 %v284_v31, 16  ;;  %v58_v39 = vadd.s32 %v584_v19, %v558_v2 }
  0x37   :  { %v408_v40 = vcvt.s32.f32 %v376_v32  ;;  %v377_v41 = vshrl.u32 %v345_v33, 8  ;;  %v378_v42 = vshrl.u32 %v346_v34, 8  ;;  %v347_v43 = vxor.u32 %v315_v35, %v283_v27 }
  0x38   :  { %470 = vst [vmem:[#allocation3 + $0x48] sm:$0xff] %v438_v36  ;;  %v439_v44 = vmul.f32 5.9604645e-08, %v407_v37  ;;  %v348_v45 = vxor.u32 %v316_v38, %v284_v31  ;;  %v93_v46 = vxor.u32 %v560_v3, %v58_v39  ;;  %v59_v47 = vadd.s32 %v584_v19, %v564_v5 }
  0x39   :  { %v440_v48 = vmul.f32 5.9604645e-08, %v408_v40  ;;  %v409_v18 = vcvt.s32.f32 %v377_v41  ;;  %v410_v49 = vcvt.s32.f32 %v378_v42  ;;  %v379_v50 = vshrl.u32 %v347_v43, 8 }
  0x3a   :  { %471 = vst [vmem:[#allocation3 + $0x50] sm:$0xff] %v439_v44  ;;  %v380_v51 = vshrl.u32 %v348_v45, 8  ;;  %v125_v52 = vshrl.u32 %v93_v46, 16  ;;  %v94_v53 = vxor.u32 %v560_v3, %v59_v47  ;;  %v60_v54 = vadd.s32 %v584_v19, %v567_v6 }
  0x3b   :  { %472 = vst [vmem:[#allocation3 + $0x58] sm:$0xff] %v440_v48  ;;  %v441_v55 = vmul.f32 5.9604645e-08, %v409_v18  ;;  %v442_v56 = vmul.f32 5.9604645e-08, %v410_v49  ;;  %v411_v57 = vcvt.s32.f32 %v379_v50  ;;  %v61_v58 = vadd.s32 %v584_v19, %v570_v7 }
  0x3c   :  { %v412_v60 = vcvt.s32.f32 %v380_v51  ;;  %v157_v61 = vxor.u32 %v125_v52, %v93_v46  ;;  %v126_v62 = vshrl.u32 %v94_v53, 16  ;;  %v95_v63 = vxor.u32 %v560_v3, %v60_v54 }
  0x3d   :  { %473 = vst [vmem:[#allocation3 + $0x60] sm:$0xff] %v441_v55  ;;  %v443_v0 = vmul.f32 5.9604645e-08, %v411_v57  ;;  %v96_v4 = vxor.u32 %v560_v3, %v61_v58  ;;  %v16_v8 = vadd.s32 40, %v556_v1  ;;  %v17_v9 = vadd.s32 48, %v556_v1 }
  0x3e   :  { %474 = vst [vmem:[#allocation3 + $0x68] sm:$0xff] %v442_v56  ;;  %v444_v10 = vmul.f32 5.9604645e-08, %v412_v60  ;;  %v189_v11 = vmul.u32 2246822507, %v157_v61  ;;  %v158_v12 = vxor.u32 %v126_v62, %v94_v53  ;;  %v127_v14 = vshrl.u32 %v95_v63, 16 }
  0x3f   :  { %475 = vst [vmem:[#allocation3 + $0x70] sm:$0xff] %v443_v0  ;;  %v128_v19 = vshrl.u32 %v96_v4, 16  ;;  %v39_v15 = vmul.u32 512, %v16_v8  ;;  %v640_v16 = vmul.u32 512, %v17_v9  ;;  %v643_v22 = vadd.s32 56, %v556_v1 }
  0x40   :  { %476 = vst [vmem:[#allocation3 + $0x78] sm:$0xff] %v444_v10  ;;  %v221_v20 = vshrl.u32 %v189_v11, 13  ;;  %v190_v13 = vmul.u32 2246822507, %v158_v12  ;;  %v159_v21 = vxor.u32 %v127_v14, %v95_v63 }
  0x41   :  { %v160_v23 = vxor.u32 %v128_v19, %v96_v4  ;;  %v62_v17 = vadd.s32 %v39_v15, %v558_v2  ;;  %v63_v24 = vadd.s32 %v39_v15, %v564_v5  ;;  %v64_v25 = vadd.s32 %v39_v15, %v567_v6 }
  0x42   :  { %v253_v59 = vxor.u32 %v221_v20, %v189_v11  ;;  %v222_v26 = vshrl.u32 %v190_v13, 13  ;;  %v191_v27 = vmul.u32 2246822507, %v159_v21  ;;  %v65_v28 = vadd.s32 %v39_v15, %v570_v7 }
  0x43   :  { %v192_v29 = vmul.u32 2246822507, %v160_v23  ;;  %v97_v30 = vxor.u32 %v560_v3, %v62_v17  ;;  %v98_v31 = vxor.u32 %v560_v3, %v63_v24  ;;  %v99_v1 = vxor.u32 %v560_v3, %v64_v25 }
  0x44   :  { %v285_v32 = vmul.u32 3266489909, %v253_v59  ;;  %v254_v33 = vxor.u32 %v222_v26, %v190_v13  ;;  %v223_v34 = vshrl.u32 %v191_v27, 13  ;;  %v100_v35 = vxor.u32 %v560_v3, %v65_v28 }
  0x45   :  { %v224_v36 = vshrl.u32 %v192_v29, 13  ;;  %v129_v37 = vshrl.u32 %v97_v30, 16  ;;  %v130_v38 = vshrl.u32 %v98_v31, 16  ;;  %v131_v39 = vshrl.u32 %v99_v1, 16 }
  0x46   :  { %v317_v40 = vshrl.u32 %v285_v32, 16  ;;  %v286_v41 = vmul.u32 3266489909, %v254_v33  ;;  %v255_v42 = vxor.u32 %v223_v34, %v191_v27  ;;  %v132_v43 = vshrl.u32 %v100_v35, 16 }
  0x47   :  { %v256_v44 = vxor.u32 %v224_v36, %v192_v29  ;;  %v161_v45 = vxor.u32 %v129_v37, %v97_v30  ;;  %v162_v46 = vxor.u32 %v130_v38, %v98_v31  ;;  %v163_v47 = vxor.u32 %v131_v39, %v99_v1 }
  0x48   :  { %v349_v48 = vxor.u32 %v317_v40, %v285_v32  ;;  %v318_v18 = vshrl.u32 %v286_v41, 16  ;;  %v287_v49 = vmul.u32 3266489909, %v255_v42  ;;  %v164_v50 = vxor.u32 %v132_v43, %v100_v35 }
  0x49   :  { %v288_v51 = vmul.u32 3266489909, %v256_v44  ;;  %v193_v52 = vmul.u32 2246822507, %v161_v45  ;;  %v194_v53 = vmul.u32 2246822507, %v162_v46  ;;  %v66_v54 = vadd.s32 %v640_v16, %v558_v2 }
  0x4a   :  { %v381_v55 = vshrl.u32 %v349_v48, 8  ;;  %v350_v56 = vxor.u32 %v318_v18, %v286_v41  ;;  %v319_v57 = vshrl.u32 %v287_v49, 16  ;;  %v195_v58 = vmul.u32 2246822507, %v163_v47 }
  0x4b   :  { %v320_v60 = vshrl.u32 %v288_v51, 16  ;;  %v225_v61 = vshrl.u32 %v193_v52, 13  ;;  %v226_v62 = vshrl.u32 %v194_v53, 13  ;;  %v196_v63 = vmul.u32 2246822507, %v164_v50 }
  0x4c   :  { %v413_v0 = vcvt.s32.f32 %v381_v55  ;;  %v382_v4 = vshrl.u32 %v350_v56, 8  ;;  %v351_v8 = vxor.u32 %v319_v57, %v287_v49  ;;  %v227_v9 = vshrl.u32 %v195_v58, 13 }
  0x4d   :  { %v352_v10 = vxor.u32 %v320_v60, %v288_v51  ;;  %v257_v11 = vxor.u32 %v225_v61, %v193_v52  ;;  %v258_v12 = vxor.u32 %v226_v62, %v194_v53  ;;  %v228_v14 = vshrl.u32 %v196_v63, 13 }
  0x4e   :  { %v445_v19 = vmul.f32 5.9604645e-08, %v413_v0  ;;  %v414_v15 = vcvt.s32.f32 %v382_v4  ;;  %v383_v20 = vshrl.u32 %v351_v8, 8  ;;  %v259_v13 = vxor.u32 %v227_v9, %v195_v58 }
  0x4f   :  { %v384_v21 = vshrl.u32 %v352_v10, 8  ;;  %v289_v23 = vmul.u32 3266489909, %v257_v11  ;;  %v290_v17 = vmul.u32 3266489909, %v258_v12  ;;  %v260_v24 = vxor.u32 %v228_v14, %v196_v63 }
  0x50   :  { %477 = vst [vmem:[#allocation3 + $0x80] sm:$0xff] %v445_v19  ;;  %v446_v25 = vmul.f32 5.9604645e-08, %v414_v15  ;;  %v415_v59 = vcvt.s32.f32 %v383_v20  ;;  %v291_v26 = vmul.u32 3266489909, %v259_v13  ;;  %v101_v27 = vxor.u32 %v560_v3, %v66_v54 }
  0x51   :  { %v416_v28 = vcvt.s32.f32 %v384_v21  ;;  %v321_v29 = vshrl.u32 %v289_v23, 16  ;;  %v322_v30 = vshrl.u32 %v290_v17, 16  ;;  %v292_v31 = vmul.u32 3266489909, %v260_v24 }
  0x52   :  { %478 = vst [vmem:[#allocation3 + $0x88] sm:$0xff] %v446_v25  ;;  %v447_v1 = vmul.f32 5.9604645e-08, %v415_v59  ;;  %v323_v32 = vshrl.u32 %v291_v26, 16  ;;  %v133_v33 = vshrl.u32 %v101_v27, 16  ;;  %v67_v34 = vadd.s32 %v640_v16, %v564_v5 }
  0x53   :  { %v448_v35 = vmul.f32 5.9604645e-08, %v416_v28  ;;  %v353_v36 = vxor.u32 %v321_v29, %v289_v23  ;;  %v354_v37 = vxor.u32 %v322_v30, %v290_v17  ;;  %v324_v38 = vshrl.u32 %v292_v31, 16 }
  0x54   :  { %479 = vst [vmem:[#allocation3 + $0x90] sm:$0xff] %v447_v1  ;;  %v355_v39 = vxor.u32 %v323_v32, %v291_v26  ;;  %v165_v40 = vxor.u32 %v133_v33, %v101_v27  ;;  %v102_v41 = vxor.u32 %v560_v3, %v67_v34  ;;  %v68_v42 = vadd.s32 %v640_v16, %v567_v6 }
  0x55   :  { %480 = vst [vmem:[#allocation3 + $0x98] sm:$0xff] %v448_v35  ;;  %v385_v43 = vshrl.u32 %v353_v36, 8  ;;  %v386_v44 = vshrl.u32 %v354_v37, 8  ;;  %v356_v45 = vxor.u32 %v324_v38, %v292_v31  ;;  %v69_v46 = vadd.s32 %v640_v16, %v570_v7 }
  0x56   :  { %v387_v47 = vshrl.u32 %v355_v39, 8  ;;  %v197_v48 = vmul.u32 2246822507, %v165_v40  ;;  %v134_v18 = vshrl.u32 %v102_v41, 16  ;;  %v103_v49 = vxor.u32 %v560_v3, %v68_v42 }
  0x57   :  { %v417_v50 = vcvt.s32.f32 %v385_v43  ;;  %v418_v51 = vcvt.s32.f32 %v386_v44  ;;  %v388_v52 = vshrl.u32 %v356_v45, 8  ;;  %v104_v53 = vxor.u32 %v560_v3, %v69_v46 }
  0x58   :  { %v419_v54 = vcvt.s32.f32 %v387_v47  ;;  %v229_v55 = vshrl.u32 %v197_v48, 13  ;;  %v166_v56 = vxor.u32 %v134_v18, %v102_v41  ;;  %v135_v57 = vshrl.u32 %v103_v49, 16 }
  0x59   :  { %v449_v58 = vmul.f32 5.9604645e-08, %v417_v50  ;;  %v450_v60 = vmul.f32 5.9604645e-08, %v418_v51  ;;  %v420_v61 = vcvt.s32.f32 %v388_v52  ;;  %v136_v62 = vshrl.u32 %v104_v53, 16 }
  0x5a   :  { %v451_v63 = vmul.f32 5.9604645e-08, %v419_v54  ;;  %v261_v16 = vxor.u32 %v229_v55, %v197_v48  ;;  %v198_v0 = vmul.u32 2246822507, %v166_v56  ;;  %v167_v4 = vxor.u32 %v135_v57, %v103_v49 }
  0x5b   :  { %481 = vst [vmem:[#allocation3 + $0xa0] sm:$0xff] %v449_v58  ;;  %v452_v8 = vmul.f32 5.9604645e-08, %v420_v61  ;;  %v168_v9 = vxor.u32 %v136_v62, %v104_v53  ;;  %v41_v10 = vmul.u32 512, %v643_v22 }
  0x5c   :  { %482 = vst [vmem:[#allocation3 + $0xa8] sm:$0xff] %v450_v60  ;;  %v293_v11 = vmul.u32 3266489909, %v261_v16  ;;  %v230_v12 = vshrl.u32 %v198_v0, 13  ;;  %v199_v14 = vmul.u32 2246822507, %v167_v4 }
  0x5d   :  { %483 = vst [vmem:[#allocation3 + $0xb0] sm:$0xff] %v451_v63  ;;  %v200_v19 = vmul.u32 2246822507, %v168_v9  ;;  %v70_v15 = vadd.s32 %v41_v10, %v558_v2  ;;  %v71_v20 = vadd.s32 %v41_v10, %v564_v5  ;;  %v72_v13 = vadd.s32 %v41_v10, %v567_v6 }
  0x5e   :  { %484 = vst [vmem:[#allocation3 + $0xb8] sm:$0xff] %v452_v8  ;;  %v325_v21 = vshrl.u32 %v293_v11, 16  ;;  %v262_v23 = vxor.u32 %v230_v12, %v198_v0  ;;  %v231_v17 = vshrl.u32 %v199_v14, 13  ;;  %v73_v24 = vadd.s32 %v41_v10, %v570_v7 }
  0x5f   :  { %v232_v25 = vshrl.u32 %v200_v19, 13  ;;  %v105_v22 = vxor.u32 %v560_v3, %v70_v15  ;;  %v106_v59 = vxor.u32 %v560_v3, %v71_v20  ;;  %v107_v26 = vxor.u32 %v560_v3, %v72_v13 }
  0x60   :  { %v357_v27 = vxor.u32 %v325_v21, %v293_v11  ;;  %v294_v28 = vmul.u32 3266489909, %v262_v23  ;;  %v263_v2 = vxor.u32 %v231_v17, %v199_v14  ;;  %v108_v5 = vxor.u32 %v560_v3, %v73_v24 }
  0x61   :  { %v264_v29 = vxor.u32 %v232_v25, %v200_v19  ;;  %v137_v6 = vshrl.u32 %v105_v22, 16  ;;  %v138_v30 = vshrl.u32 %v106_v59, 16  ;;  %v139_v31 = vshrl.u32 %v107_v26, 16 }
  0x62   :  { %v389_v1 = vshrl.u32 %v357_v27, 8  ;;  %v326_v32 = vshrl.u32 %v294_v28, 16  ;;  %v295_v33 = vmul.u32 3266489909, %v263_v2  ;;  %v140_v7 = vshrl.u32 %v108_v5, 16 }
  0x63   :  { %v296_v34 = vmul.u32 3266489909, %v264_v29  ;;  %v169_v35 = vxor.u32 %v137_v6, %v105_v22  ;;  %v170_v36 = vxor.u32 %v138_v30, %v106_v59  ;;  %v171_v37 = vxor.u32 %v139_v31, %v107_v26 }
  0x64   :  { %v421_v38 = vcvt.s32.f32 %v389_v1  ;;  %v358_v39 = vxor.u32 %v326_v32, %v294_v28  ;;  %v327_v40 = vshrl.u32 %v295_v33, 16  ;;  %v172_v41 = vxor.u32 %v140_v7, %v108_v5 }
  0x65   :  { %v328_v42 = vshrl.u32 %v296_v34, 16  ;;  %v201_v43 = vmul.u32 2246822507, %v169_v35  ;;  %v202_v44 = vmul.u32 2246822507, %v170_v36 }
  0x66   :  { %v453_v3 = vmul.f32 5.9604645e-08, %v421_v38  ;;  %v390_v45 = vshrl.u32 %v358_v39, 8  ;;  %v359_v46 = vxor.u32 %v327_v40, %v295_v33  ;;  %v203_v47 = vmul.u32 2246822507, %v171_v37 }
  0x67   :  { %v360_v48 = vxor.u32 %v328_v42, %v296_v34  ;;  %v233_v18 = vshrl.u32 %v201_v43, 13  ;;  %v234_v49 = vshrl.u32 %v202_v44, 13  ;;  %v204_v50 = vmul.u32 2246822507, %v172_v41 }
  0x68   :  { %485 = vst [vmem:[#allocation3 + $0xc0] sm:$0xff] %v453_v3  ;;  %v422_v51 = vcvt.s32.f32 %v390_v45  ;;  %v391_v52 = vshrl.u32 %v359_v46, 8  ;;  %v235_v53 = vshrl.u32 %v203_v47, 13 }
  0x69   :  { %v392_v54 = vshrl.u32 %v360_v48, 8  ;;  %v265_v55 = vxor.u32 %v233_v18, %v201_v43  ;;  %v266_v56 = vxor.u32 %v234_v49, %v202_v44  ;;  %v236_v57 = vshrl.u32 %v204_v50, 13 }
  0x6a   :  { %v454_v58 = vmul.f32 5.9604645e-08, %v422_v51  ;;  %v423_v60 = vcvt.s32.f32 %v391_v52  ;;  %v267_v61 = vxor.u32 %v235_v53, %v203_v47 }
  0x6b   :  { %v424_v62 = vcvt.s32.f32 %v392_v54  ;;  %v297_v63 = vmul.u32 3266489909, %v265_v55  ;;  %v298_v16 = vmul.u32 3266489909, %v266_v56  ;;  %v268_v0 = vxor.u32 %v236_v57, %v204_v50 }
  0x6c   :  { %486 = vst [vmem:[#allocation3 + $0xc8] sm:$0xff] %v454_v58  ;;  %v455_v4 = vmul.f32 5.9604645e-08, %v423_v60  ;;  %v299_v8 = vmul.u32 3266489909, %v267_v61 }
  0x6d   :  { %v456_v9 = vmul.f32 5.9604645e-08, %v424_v62  ;;  %v329_v10 = vshrl.u32 %v297_v63, 16  ;;  %v330_v11 = vshrl.u32 %v298_v16, 16  ;;  %v300_v12 = vmul.u32 3266489909, %v268_v0 }
  0x6e   :  { %487 = vst [vmem:[#allocation3 + $0xd0] sm:$0xff] %v455_v4  ;;  %v331_v14 = vshrl.u32 %v299_v8, 16 }
  0x6f   :  { %488 = vst [vmem:[#allocation3 + $0xd8] sm:$0xff] %v456_v9  ;;  %v361_v19 = vxor.u32 %v329_v10, %v297_v63  ;;  %v362_v15 = vxor.u32 %v330_v11, %v298_v16  ;;  %v332_v20 = vshrl.u32 %v300_v12, 16 }
  0x70   :  { %v363_v13 = vxor.u32 %v331_v14, %v299_v8 }
  0x71   :  { %v393_v21 = vshrl.u32 %v361_v19, 8  ;;  %v394_v23 = vshrl.u32 %v362_v15, 8  ;;  %v364_v17 = vxor.u32 %v332_v20, %v300_v12 }
  0x72   :  { %v395_v24 = vshrl.u32 %v363_v13, 8 }
  0x73   :  { %v425_v25 = vcvt.s32.f32 %v393_v21  ;;  %v426_v22 = vcvt.s32.f32 %v394_v23  ;;  %v396_v59 = vshrl.u32 %v364_v17, 8 }
  0x74   :  { %v427_v26 = vcvt.s32.f32 %v395_v24 }
  0x75   :  { %v457_v27 = vmul.f32 5.9604645e-08, %v425_v25  ;;  %v458_v28 = vmul.f32 5.9604645e-08, %v426_v22  ;;  %v428_v2 = vcvt.s32.f32 %v396_v59 }
  0x76   :  { %v459_v5 = vmul.f32 5.9604645e-08, %v427_v26 }
  0x77   :  { %489 = vst [vmem:[#allocation3 + $0xe0] sm:$0xff] %v457_v27  ;;  %v460_v29 = vmul.f32 5.9604645e-08, %v428_v2 }
  0x78   :  { %490 = vst [vmem:[#allocation3 + $0xe8] sm:$0xff] %v458_v28 }
  0x79   :  { %491 = vst [vmem:[#allocation3 + $0xf0] sm:$0xff] %v459_v5 }
  0x7a   :  { %492 = vst [vmem:[#allocation3 + $0xf8] sm:$0xff] %v460_v29 }
  0x7b   :  { %505 = dma.vmem_to_hbm [thread:$0]  %s498_s9, 4096, %s500_s12, [#allocation4], %s541_s13, %s541_s13, %s542_s14  }
  0x7c   :  { %538 = dma.done.wait [#allocation4], 4096  }
  0x7d   :  { %539 = vsyncadd [#allocation4], 4294963200 }
  0x7e   :  { %510 = vsyncpa [#allocation4], 1 }

</bundles_post_ra>
